<compile_context>
chip_gen: v6e
topology: v6e:2x2x1
jax: 0.10.0
libtpu: 0.0.40
codegen_flags: <defaults>
</compile_context>

<pallas_src>
import functools

import jax
import jax.numpy as jnp
from jax.experimental import pallas as pl
from jax.experimental.pallas import tpu as pltpu

BN_EPS = 1e-5
NUM_LAYERS = 3
LANE = 128


def _round_up(n, m):
    return ((n + m - 1) // m) * m


def dqn_kernel(x_ref, w1, w2, w3, bh, wo, bo, out_ref, *, matmul_dtype):
    """Fused MLP forward for one batch tile.

    BN (eval) + linear bias are pre-folded into (W', b'); bh is the packed
    (num_layers, H) fused-bias array.  Matmul inputs are cast to `matmul_dtype`
    (bf16 on v6e/v7x for MXU throughput), accumulation and elementwise math
    stay in f32.
    """
    h = x_ref[...]
    for li, w in enumerate((w1, w2, w3)):
        z = jnp.dot(h.astype(matmul_dtype), w[...].astype(matmul_dtype),
                    preferred_element_type=jnp.float32)
        z = z + bh[li:li + 1, :]            # folded BN + bias (f32)
        h = z * jax.nn.sigmoid(z)           # SiLU; Dropout = identity (eval)
    out_ref[...] = (
        jnp.dot(h.astype(matmul_dtype), wo[...].astype(matmul_dtype),
                preferred_element_type=jnp.float32)
        + bo[...]
    )


def fold_params(raw_params, action_pad):
    """Fold eval-mode BN + bias into the weights; pad the output layer lanes.

    raw_params layout (per hidden layer): [W (in,out), b (1,out), gamma, beta,
    running_mean, running_var], then [Wo (H,A), bo (1,A)].
    Returns [W1', W2', W3', b_hidden (L,H), Wo_pad, bo_pad].
    """
    fused_w, biases = [], []
    for li in range(NUM_LAYERS):
        w, b, g, be, m, v = raw_params[6 * li: 6 * li + 6]
        scale = g * jax.lax.rsqrt(v + BN_EPS)                # (1, out)
        fused_w.append((w * scale).astype(jnp.float32))      # column-wise fold
        biases.append(((b - m) * scale + be).reshape(-1))
    b_hidden = jnp.stack(biases, axis=0).astype(jnp.float32)  # (L, H)

    wo, bo = raw_params[-2:]
    H, A = wo.shape
    wo_p = jnp.zeros((H, action_pad), jnp.float32).at[:, :A].set(wo)
    bo_p = jnp.zeros((1, action_pad), jnp.float32).at[:, :A].set(bo)
    return fused_w + [b_hidden, wo_p, bo_p]


def dqn_forward(x, raw_params, *, batch_tile=None, matmul_dtype=jnp.bfloat16):
    """x: (B, state_dim) or (state_dim,).  raw_params: list from init_params."""
    if x.ndim == 1:                     # mirror torch's unsqueeze(0)
        x = x[None, :]
    x = x.astype(jnp.float32)
    B, S = x.shape
    H = raw_params[0].shape[1]
    A = raw_params[-1].shape[-1]
    A_pad = _round_up(A, LANE)          # lane-dense output, sliced back below

    params = fold_params(raw_params, A_pad)

    # Batch tile: single tile for small B (latency path); 256-row tiles for big
    # B so the MXU M-dim is filled and the grid has >= 2 steps (both v7x TCs).
    if batch_tile is None:
        if B <= 256:
            tb = B
        else:
            tb = next((c for c in (256, 512, 128, 64, 32, 16, 8) if B % c == 0), B)
    else:
        tb = batch_tile
    assert B % tb == 0
    assert tb == B or tb % 8 == 0, "partial batch tiles must be multiples of 8"

    # VMEM budget for the all-weights-resident design (v7x: 64 MiB physical).
    param_bytes = sum(int(p.size) * p.dtype.itemsize for p in params)
    vmem_est = (param_bytes
                + 2 * tb * (S + A_pad) * 4       # double-buffered in/out tiles
                + 4 * tb * H * 4)                # activation temporaries
    assert vmem_est < 48 * 2 ** 20, (
        f"~{vmem_est / 2**20:.1f} MiB VMEM needed; all-weights-resident design "
        "won't fit v7x (64 MiB) — add a K/N grid axis instead.")
    vmem_limit = None
    if vmem_est > 24 * 2 ** 20:                  # above ~3/4 of scoped default
        vmem_limit = min(56 * 2 ** 20, 2 * vmem_est)

    def full_spec(p):
        return pl.BlockSpec(p.shape, lambda i: (0,) * p.ndim)

    in_specs = [pl.BlockSpec((tb, S), lambda i: (i, 0))] + [full_spec(p) for p in params]
    out_spec = pl.BlockSpec((tb, A_pad), lambda i: (i, 0))

    out = pl.pallas_call(
        functools.partial(dqn_kernel, matmul_dtype=matmul_dtype),
        out_shape=jax.ShapeDtypeStruct((B, A_pad), jnp.float32),
        grid_spec=pltpu.PrefetchScalarGridSpec(
            num_scalar_prefetch=0,
            grid=(B // tb,),
            in_specs=in_specs,
            out_specs=out_spec,
        ),
        compiler_params=pltpu.CompilerParams(
            dimension_semantics=("parallel",),
            vmem_limit_bytes=vmem_limit),
    )(x, *params)
    return out[:, :A]


def init_params(key, state_dim, action_dim, hidden_dim, num_layers=3):
    """Deterministic synthetic parameters (same shapes as the torch module)."""
    params = []
    dims = [state_dim] + [hidden_dim] * num_layers
    for li in range(num_layers):
        kin, kout = dims[li], dims[li + 1]
        key, kw, kb, kg, kbe, km, kv = jax.random.split(key, 7)
        w = jax.random.normal(kw, (kin, kout), jnp.float32) * (1.0 / jnp.sqrt(kin))
        b = jax.random.normal(kb, (1, kout), jnp.float32) * 0.1
        gamma = 1.0 + 0.1 * jax.random.normal(kg, (1, kout), jnp.float32)
        beta = 0.1 * jax.random.normal(kbe, (1, kout), jnp.float32)
        rmean = 0.1 * jax.random.normal(km, (1, kout), jnp.float32)
        rvar = 1.0 + 0.1 * jax.random.uniform(kv, (1, kout), jnp.float32)
        params += [w, b, gamma, beta, rmean, rvar]
    key, kw, kb = jax.random.split(key, 3)
    wo = jax.random.normal(kw, (hidden_dim, action_dim), jnp.float32) * (1.0 / jnp.sqrt(hidden_dim))
    bo = jax.random.normal(kb, (1, action_dim), jnp.float32) * 0.1
    params += [wo, bo]
    return params


def reference_forward(x, raw_params):
    """Pure-JAX f32 reference with the original (un-folded) module semantics."""
    h = x.astype(jnp.float32)
    for li in range(NUM_LAYERS):
        w, b, g, be, m, v = raw_params[6 * li: 6 * li + 6]
        z = h @ w + b
        z = (z - m) * jax.lax.rsqrt(v + BN_EPS) * g + be
        h = z * jax.nn.sigmoid(z)
    wo, bo = raw_params[-2:]
    return h @ wo + bo


if __name__ == "__main__":
    STATE_DIM, ACTION_DIM, HIDDEN_DIM, NUM_LAYERS_ = 16, 8, 128, 3
    BATCH = 8

    key = jax.random.PRNGKey(0)
    key, kx = jax.random.split(key)
    x = jax.random.normal(kx, (BATCH, STATE_DIM), jnp.float32)
    params = init_params(key, STATE_DIM, ACTION_DIM, HIDDEN_DIM, NUM_LAYERS_)

    ref = reference_forward(x, params)

    # f32 MXU path: tight tolerance vs. the un-folded reference.
    out_f32 = jax.block_until_ready(dqn_forward(x, params, matmul_dtype=jnp.float32))
    assert out_f32.shape == (BATCH, ACTION_DIM)
    assert jnp.allclose(out_f32, ref, atol=1e-4, rtol=1e-4), "f32 mismatch vs reference"

    # bf16 MXU path (default, recommended on v6e/v7x): looser tolerance.
    out_bf16 = jax.block_until_ready(dqn_forward(x, params))
    assert out_bf16.shape == (BATCH, ACTION_DIM)
    assert jnp.allclose(out_bf16, ref, atol=5e-2, rtol=5e-2), "bf16 mismatch vs reference"

    print("KERNEL_OK")
</pallas_src>

<mosaic_0001>
module attributes {stable_mosaic.version = 11 : i64} {
  func.func @dqn_kernel(%arg0: i32, %arg1: memref<8x16xf32, #tpu.memory_space<vmem>>, %arg2: memref<16x128xf32, #tpu.memory_space<vmem>>, %arg3: memref<128x128xf32, #tpu.memory_space<vmem>>, %arg4: memref<128x128xf32, #tpu.memory_space<vmem>>, %arg5: memref<3x128xf32, #tpu.memory_space<vmem>>, %arg6: memref<128x128xf32, #tpu.memory_space<vmem>>, %arg7: memref<1x128xf32, #tpu.memory_space<vmem>>, %arg8: memref<8x128xf32, #tpu.memory_space<vmem>>) attributes {dimension_semantics = [#tpu.dimension_semantics<parallel>], iteration_bounds = array<i64: 1>, scalar_prefetch = 0 : i64, scratch_operands = 0 : i64, tpu.core_type = #tpu.core_type<tc>, window_params = [{transform_indices = @transform_0, window_bounds = array<i64: 8, 16>}, {pipeline_mode = #tpu.pipeline_mode<synchronous>, transform_indices = @transform_1, window_bounds = array<i64: 16, 128>}, {pipeline_mode = #tpu.pipeline_mode<synchronous>, transform_indices = @transform_2, window_bounds = array<i64: 128, 128>}, {pipeline_mode = #tpu.pipeline_mode<synchronous>, transform_indices = @transform_3, window_bounds = array<i64: 128, 128>}, {pipeline_mode = #tpu.pipeline_mode<synchronous>, transform_indices = @transform_4, window_bounds = array<i64: 3, 128>}, {pipeline_mode = #tpu.pipeline_mode<synchronous>, transform_indices = @transform_5, window_bounds = array<i64: 128, 128>}, {pipeline_mode = #tpu.pipeline_mode<synchronous>, transform_indices = @transform_6, window_bounds = array<i64: 1, 128>}, {transform_indices = @transform_7, window_bounds = array<i64: 8, 128>}]} {
    %c0 = arith.constant 0 : index
    %c0_0 = arith.constant 0 : index
    %0 = vector.load %arg1[%c0, %c0_0] : memref<8x16xf32, #tpu.memory_space<vmem>>, vector<8x16xf32>
    %c0_1 = arith.constant 0 : index
    %c0_2 = arith.constant 0 : index
    %1 = vector.load %arg2[%c0_1, %c0_2] : memref<16x128xf32, #tpu.memory_space<vmem>>, vector<16x128xf32>
    %cst = arith.constant dense<0.000000e+00> : vector<8x128xf32>
    %2 = tpu.matmul %0, %1, %cst {dimension_numbers = #tpu.dot_dimension_numbers<[1], [0], [0], [1], [0, 0, 1, 1], [], []>} : vector<8x16xf32>, vector<16x128xf32>, vector<8x128xf32> -> vector<8x128xf32>
    %c0_3 = arith.constant 0 : index
    %c0_4 = arith.constant 0 : index
    %3 = vector.load %arg5[%c0_3, %c0_4] : memref<3x128xf32, #tpu.memory_space<vmem>>, vector<1x128xf32>
    %4 = vector.broadcast %3 : vector<1x128xf32> to vector<8x128xf32>
    %5 = arith.addf %2, %4 : vector<8x128xf32>
    %6 = arith.negf %5 : vector<8x128xf32>
    %7 = math.exp %6 : vector<8x128xf32>
    %cst_5 = arith.constant 1.000000e+00 : f32
    %8 = vector.broadcast %cst_5 : f32 to vector<8x128xf32>
    %9 = arith.addf %8, %7 : vector<8x128xf32>
    %10 = arith.divf %8, %9 : vector<8x128xf32>
    %11 = arith.mulf %5, %10 : vector<8x128xf32>
    %c0_6 = arith.constant 0 : index
    %c0_7 = arith.constant 0 : index
    %12 = vector.load %arg3[%c0_6, %c0_7] : memref<128x128xf32, #tpu.memory_space<vmem>>, vector<128x128xf32>
    %cst_8 = arith.constant dense<0.000000e+00> : vector<8x128xf32>
    %13 = tpu.matmul %11, %12, %cst_8 {dimension_numbers = #tpu.dot_dimension_numbers<[1], [0], [0], [1], [0, 0, 1, 1], [], []>} : vector<8x128xf32>, vector<128x128xf32>, vector<8x128xf32> -> vector<8x128xf32>
    %c1 = arith.constant 1 : index
    %c0_9 = arith.constant 0 : index
    %14 = vector.load %arg5[%c1, %c0_9] : memref<3x128xf32, #tpu.memory_space<vmem>>, vector<1x128xf32>
    %15 = vector.broadcast %14 : vector<1x128xf32> to vector<8x128xf32>
    %16 = arith.addf %13, %15 : vector<8x128xf32>
    %17 = arith.negf %16 : vector<8x128xf32>
    %18 = math.exp %17 : vector<8x128xf32>
    %cst_10 = arith.constant 1.000000e+00 : f32
    %19 = vector.broadcast %cst_10 : f32 to vector<8x128xf32>
    %20 = arith.addf %19, %18 : vector<8x128xf32>
    %21 = arith.divf %19, %20 : vector<8x128xf32>
    %22 = arith.mulf %16, %21 : vector<8x128xf32>
    %c0_11 = arith.constant 0 : index
    %c0_12 = arith.constant 0 : index
    %23 = vector.load %arg4[%c0_11, %c0_12] : memref<128x128xf32, #tpu.memory_space<vmem>>, vector<128x128xf32>
    %cst_13 = arith.constant dense<0.000000e+00> : vector<8x128xf32>
    %24 = tpu.matmul %22, %23, %cst_13 {dimension_numbers = #tpu.dot_dimension_numbers<[1], [0], [0], [1], [0, 0, 1, 1], [], []>} : vector<8x128xf32>, vector<128x128xf32>, vector<8x128xf32> -> vector<8x128xf32>
    %c2 = arith.constant 2 : index
    %c0_14 = arith.constant 0 : index
    %25 = vector.load %arg5[%c2, %c0_14] : memref<3x128xf32, #tpu.memory_space<vmem>>, vector<1x128xf32>
    %26 = vector.broadcast %25 : vector<1x128xf32> to vector<8x128xf32>
    %27 = arith.addf %24, %26 : vector<8x128xf32>
    %28 = arith.negf %27 : vector<8x128xf32>
    %29 = math.exp %28 : vector<8x128xf32>
    %cst_15 = arith.constant 1.000000e+00 : f32
    %30 = vector.broadcast %cst_15 : f32 to vector<8x128xf32>
    %31 = arith.addf %30, %29 : vector<8x128xf32>
    %32 = arith.divf %30, %31 : vector<8x128xf32>
    %33 = arith.mulf %27, %32 : vector<8x128xf32>
    %c0_16 = arith.constant 0 : index
    %c0_17 = arith.constant 0 : index
    %34 = vector.load %arg6[%c0_16, %c0_17] : memref<128x128xf32, #tpu.memory_space<vmem>>, vector<128x128xf32>
    %cst_18 = arith.constant dense<0.000000e+00> : vector<8x128xf32>
    %35 = tpu.matmul %33, %34, %cst_18 {dimension_numbers = #tpu.dot_dimension_numbers<[1], [0], [0], [1], [0, 0, 1, 1], [], []>} : vector<8x128xf32>, vector<128x128xf32>, vector<8x128xf32> -> vector<8x128xf32>
    %c0_19 = arith.constant 0 : index
    %c0_20 = arith.constant 0 : index
    %36 = vector.load %arg7[%c0_19, %c0_20] : memref<1x128xf32, #tpu.memory_space<vmem>>, vector<1x128xf32>
    %37 = vector.broadcast %36 : vector<1x128xf32> to vector<8x128xf32>
    %38 = arith.addf %35, %37 : vector<8x128xf32>
    %c0_21 = arith.constant 0 : index
    %c0_22 = arith.constant 0 : index
    %39 = vector.load %arg8[%c0_21, %c0_22] : memref<8x128xf32, #tpu.memory_space<vmem>>, vector<8x128xf32>
    tpu.vector_store %arg8[%c0_21, %c0_22], %38 {strides = array<i32>} : memref<8x128xf32, #tpu.memory_space<vmem>>, vector<8x128xf32>,
    return
  }
  func.func @transform_0(%arg0: i32) -> (i32, i32) {
    %c0_i32 = arith.constant 0 : i32
    %c0_i32_0 = arith.constant 0 : i32
    return %arg0, %c0_i32 : i32, i32
  }
  func.func @transform_1(%arg0: i32) -> (i32, i32) {
    %c0_i32 = arith.constant 0 : i32
    %c0_i32_0 = arith.constant 0 : i32
    %c0_i32_1 = arith.constant 0 : i32
    return %c0_i32, %c0_i32_0 : i32, i32
  }
  func.func @transform_2(%arg0: i32) -> (i32, i32) {
    %c0_i32 = arith.constant 0 : i32
    %c0_i32_0 = arith.constant 0 : i32
    %c0_i32_1 = arith.constant 0 : i32
    return %c0_i32, %c0_i32_0 : i32, i32
  }
  func.func @transform_3(%arg0: i32) -> (i32, i32) {
    %c0_i32 = arith.constant 0 : i32
    %c0_i32_0 = arith.constant 0 : i32
    %c0_i32_1 = arith.constant 0 : i32
    return %c0_i32, %c0_i32_0 : i32, i32
  }
  func.func @transform_4(%arg0: i32) -> (i32, i32) {
    %c0_i32 = arith.constant 0 : i32
    %c0_i32_0 = arith.constant 0 : i32
    %c0_i32_1 = arith.constant 0 : i32
    return %c0_i32, %c0_i32_0 : i32, i32
  }
  func.func @transform_5(%arg0: i32) -> (i32, i32) {
    %c0_i32 = arith.constant 0 : i32
    %c0_i32_0 = arith.constant 0 : i32
    %c0_i32_1 = arith.constant 0 : i32
    return %c0_i32, %c0_i32_0 : i32, i32
  }
  func.func @transform_6(%arg0: i32) -> (i32, i32) {
    %c0_i32 = arith.constant 0 : i32
    %c0_i32_0 = arith.constant 0 : i32
    %c0_i32_1 = arith.constant 0 : i32
    return %c0_i32, %c0_i32_0 : i32, i32
  }
  func.func @transform_7(%arg0: i32) -> (i32, i32) {
    %c0_i32 = arith.constant 0 : i32
    %c0_i32_0 = arith.constant 0 : i32
    return %arg0, %c0_i32 : i32, i32
  }
}

</mosaic_0001>

<bundles_post_ra>
// kernel: tpu_custom_call.1
= control target key start
LH: loop header
LB: loop body
LE: loop exit
PB: predicated region body
PF: predicated region fallthrough
CT: control target
= control target key end

     0   :  { %12 = vsyncpa [#allocation3], 0  ;;  %s963_s0 = inlined_call_operand.hbm [shape: f32[8,16], index: 0, kind: input, shape index: {}]   ;;  %s964_s1 = inlined_call_operand.hbm [shape: f32[16,128], index: 1, kind: input, shape index: {}]   ;;  %s965_s2 = inlined_call_operand.hbm [shape: f32[128,128], index: 2, kind: input, shape index: {}]   ;;  %s966_s3 = inlined_call_operand.hbm [shape: f32[128,128], index: 3, kind: input, shape index: {}]   ;;  %s967_s4 = inlined_call_operand.vmem [shape: f32[3,128], index: 4, kind: input, shape index: {}]   ;;  %s968_s5 = inlined_call_operand.hbm [shape: f32[128,128], index: 5, kind: input, shape index: {}]   ;;  %s969_s6 = inlined_call_operand.vmem [shape: f32[1,128], index: 6, kind: input, shape index: {}]   ;;  %s970_s7 = inlined_call_operand.hbm [shape: f32[8,128], index: 7, kind: output, shape index: {}]  }
   0x1   :  { %13 = vsyncpa [#allocation6], 0 }
   0x2   :  { %14 = vsyncpa [#allocation9], 0 }
   0x3   :  { %15 = vsyncpa [#allocation4], 0  ;;  %s813_s24 = smov [#allocation5]  }
   0x4   :  { %s31_s25 = sshll.u32 %s813_s24, 4  ;;  %s32_s25 = int_to_ptr.vmem [resolvable:$true] %s31_s25 }
   0x5   :  { %s693_s26 = scalar_lea.vmem %s32_s25, 256  ;;  %p698_p1 = scmp.lt.s32.totalorder %s32_s25, %s32_s25 }
   0x6   :  { %p694_p0 = scmp.ne.s32.totalorder %s32_s25, %s693_s26  ;;  %p699_p2 = scmp.lt.s32.totalorder %s693_s26, %s693_s26 }
   0x8   :  { %p700_p3 = por %p699_p2, %p698_p1 }
   0xa   :  { %p701_p4 = pnand %p700_p3, %p694_p0 }
   0xc   :  { %704 = shalt.err (!%p701_p4)
}
   0xd   :  { %s814_s27 = smov 128   ;;  %s815_s28 = smov 8  }
   0xe   :  { %37 = dma.hbm_to_vmem [thread:$0]  %s964_s1, 256, %s32_s25, [#allocation6], %s814_s27, %s814_s27, %s815_s28  }
   0xf   :  { %s816_s8 = smov [#allocation8]   ;;  %s817_s10 = smov [#allocation2]  }
  0x10   :  { %s55_s9 = sshll.u32 %s816_s8, 4  ;;  %s22_s11 = sshll.u32 %s817_s10, 4  ;;  %s56_s9 = int_to_ptr.vmem [resolvable:$true] %s55_s9  ;;  %s23_s11 = int_to_ptr.vmem [resolvable:$true] %s22_s11 }
  0x11   :  { %s713_s12 = scalar_lea.vmem %s56_s9, 2048  ;;  %p718_p6 = scmp.lt.s32.totalorder %s56_s9, %s56_s9 }
  0x12   :  { %p714_p5 = scmp.ne.s32.totalorder %s56_s9, %s713_s12  ;;  %p719_p7 = scmp.lt.s32.totalorder %s713_s12, %s713_s12 }
  0x14   :  { %p720_p8 = por %p719_p7, %p718_p6 }
  0x16   :  { %p721_p9 = pnand %p720_p8, %p714_p5 }
  0x18   :  { %724 = shalt.err (!%p721_p9)
}
  0x19   :  { %61 = dma.hbm_to_vmem [thread:$0]  %s966_s3, 2048, %s56_s9, [#allocation9], %s814_s27, %s814_s27, %s815_s28  }
  0x1a   :  { %s733_s1 = scalar_lea.vmem %s23_s11, 128  ;;  %p738_p11 = scmp.lt.s32.totalorder %s23_s11, %s23_s11 }
  0x1b   :  { %p734_p10 = scmp.ne.s32.totalorder %s23_s11, %s733_s1  ;;  %p739_p12 = scmp.lt.s32.totalorder %s733_s1, %s733_s1 }
  0x1d   :  { %p740_p13 = por %p739_p12, %p738_p11 }
  0x1f   :  { %p741_p0 = pnand %p740_p13, %p734_p10 }
  0x21   :  { %744 = shalt.err (!%p741_p0)
}
  0x22   :  { %25 = dma.hbm_to_vmem [thread:$0]  %s963_s0, 128, %s23_s11, [#allocation3]  }
  0x23   :  { %s818_s17 = smov [#allocation7]   ;;  %s819_s19 = smov [#allocation10]  }
  0x24   :  { %s43_s18 = sshll.u32 %s818_s17, 4  ;;  %s69_s20 = sshll.u32 %s819_s19, 4  ;;  %s44_s18 = int_to_ptr.vmem [resolvable:$true] %s43_s18  ;;  %s70_s20 = int_to_ptr.vmem [resolvable:$true] %s69_s20 }
  0x25   :  { %s753_s21 = scalar_lea.vmem %s44_s18, 2048  ;;  %p758_p2 = scmp.lt.s32.totalorder %s44_s18, %s44_s18 }
  0x26   :  { %p754_p1 = scmp.ne.s32.totalorder %s44_s18, %s753_s21  ;;  %p759_p3 = scmp.lt.s32.totalorder %s753_s21, %s753_s21 }
  0x28   :  { %p760_p4 = por %p759_p3, %p758_p2 }
  0x2a   :  { %p761_p5 = pnand %p760_p4, %p754_p1 }
  0x2c   :  { %764 = shalt.err (!%p761_p5)
}
  0x2d   :  { %49 = dma.hbm_to_vmem [thread:$0]  %s965_s2, 2048, %s44_s18, [#allocation6], %s814_s27, %s814_s27, %s815_s28  }
  0x2e   :  { %s773_s0 = scalar_lea.vmem %s70_s20, 2048  ;;  %p778_p7 = scmp.lt.s32.totalorder %s70_s20, %s70_s20 }
  0x2f   :  { %p774_p6 = scmp.ne.s32.totalorder %s70_s20, %s773_s0  ;;  %p779_p8 = scmp.lt.s32.totalorder %s773_s0, %s773_s0 }
  0x31   :  { %p780_p9 = por %p779_p8, %p778_p7 }
  0x33   :  { %p781_p10 = pnand %p780_p9, %p774_p6 }
  0x35   :  { %784 = shalt.err (!%p781_p10)
}
  0x36   :  { %75 = dma.hbm_to_vmem [thread:$0]  %s968_s5, 2048, %s70_s20, [#allocation9], %s814_s27, %s814_s27, %s815_s28  }
  0x37   :  { %805 = dma.done.wait [#allocation3], 128  }
  0x38   :  { %806 = vsyncadd [#allocation3], 4294967168 }
  0x39   :  { %807 = dma.done.wait [#allocation6], 2304  }
  0x3a   :  { %808 = vsyncadd [#allocation6], 4294964992 }
  0x3b   :  { %809 = dma.done.wait [#allocation9], 4096  }
  0x3c   :  { %810 = vsyncadd [#allocation9], 4294963200  ;;  %v820_v0 = vmov 0.0   ;;  %vm821_vm0 = vmmov 0   ;;  %v95_v1 = vld [vmem:[#allocation5 + $0x8] sm:$0xff]  ;;  %v94_v2 = vld [vmem:[#allocation5] sm:$0xff] }
  0x3d   :  { %551 = vmatprep.subr.mxu0 %v820_v0  ;;  %555 = vmatprep.mubr.msk.f32.mxu0 %vm821_vm0, %v820_v0  ;;  %v93_v3 = vld [vmem:[#allocation2] sm:$0xff]  ;;  %vm101_vm1 = vcmask 130048   ;;  %v197_v4 = vld [vmem:[#allocation7 + $0x78] sm:$0xff]  ;;  %v196_v5 = vld [vmem:[#allocation7 + $0x70] sm:$0xff]  ;;  %s822_s8 = smov [#allocation11]  }
  0x3e   :  { %558 = vmatprep.subr.mxu1 %v820_v0  ;;  %590 = vmatprep.mubr.msk.f32.mxu1 %vm821_vm0, %v820_v0  ;;  %v195_v6 = vld [vmem:[#allocation7 + $0x68] sm:$0xff]  ;;  %v194_v7 = vld [vmem:[#allocation7 + $0x60] sm:$0xff]  ;;  %v193_v8 = vld [vmem:[#allocation7 + $0x58] sm:$0xff]  ;;  %s478_s9 = sshll.u32 %s822_s8, 4  ;;  %s479_s9 = int_to_ptr.vmem [resolvable:$true] %s478_s9 }
  0x3f   :  { %552 = vmatpush3.msra.mxu0 %v95_v1  ;;  %559 = vmatpush3.msra.mxu1 %v197_v4  ;;  %v192_v9 = vld [vmem:[#allocation7 + $0x50] sm:$0xff]  ;;  %v191_v10 = vld [vmem:[#allocation7 + $0x48] sm:$0xff]  ;;  %v190_v11 = vld [vmem:[#allocation7 + $0x40] sm:$0xff]  ;;  %p790_p12 = scmp.lt.s32.totalorder %s479_s9, %s479_s9 }
  0x40   :  { %553 = vmatprep.subr.mxu0 %v820_v0  ;;  %560 = vmatprep.subr.mxu1 %v820_v0  ;;  %v189_v12 = vld [vmem:[#allocation7 + $0x38] sm:$0xff]  ;;  %v188_v13 = vld [vmem:[#allocation7 + $0x30] sm:$0xff]  ;;  %v187_v14 = vld [vmem:[#allocation7 + $0x28] sm:$0xff] }
  0x41   :  { %554 = vmatpush3.msra.mxu0 %v94_v2  ;;  %561 = vmatpush3.msra.mxu1 %v196_v5  ;;  %v186_v15 = vld [vmem:[#allocation7 + $0x20] sm:$0xff]  ;;  %v185_v16 = vld [vmem:[#allocation7 + $0x18] sm:$0xff]  ;;  %v184_v17 = vld [vmem:[#allocation7 + $0x10] sm:$0xff] }
  0x42   :  { %556 = vmatmul.mubr.msk.f32.vlgmr.msra.gmra.mxu0 %vm101_vm1, %v93_v3  ;;  %593 = vmatprep.subr.mxu0 %v820_v0  ;;  %v183_v18 = vld [vmem:[#allocation7 + $0x8] sm:$0xff]  ;;  %v182_v19 = vld [vmem:[#allocation7] sm:$0xff]  ;;  %v295_v29 = vld [vmem:[#allocation8 + $0x78] sm:$0xff] }
  0x43   :  { %625 = vmatprep.mubr.msk.f32.mxu0 %vm821_vm0, %v820_v0  ;;  %562 = vmatprep.subr.mxu1 %v820_v0  ;;  %v489_v20 = vld [vmem:[%s967_s4] ss:$0 sm:$0xff]  ;;  %v294_v30 = vld [vmem:[#allocation8 + $0x70] sm:$0xff]  ;;  %v292_v32 = vld [vmem:[#allocation8 + $0x60] sm:$0xff] }
  0x44   :  { %563 = vmatpush3.msra.mxu1 %v195_v6  ;;  %594 = vmatpush3.msra.mxu0 %v295_v29  ;;  %v293_v31 = vld [vmem:[#allocation8 + $0x68] sm:$0xff]  ;;  %v291_v33 = vld [vmem:[#allocation8 + $0x58] sm:$0xff]  ;;  %v290_v34 = vld [vmem:[#allocation8 + $0x50] sm:$0xff] }
  0x45   :  { %564 = vmatprep.subr.mxu1 %v820_v0  ;;  %595 = vmatprep.subr.mxu0 %v820_v0  ;;  %v289_v35 = vld [vmem:[#allocation8 + $0x48] sm:$0xff]  ;;  %v288_v36 = vld [vmem:[#allocation8 + $0x40] sm:$0xff]  ;;  %v287_v37 = vld [vmem:[#allocation8 + $0x38] sm:$0xff] }
  0x46   :  { %565 = vmatpush3.msra.mxu1 %v194_v7  ;;  %596 = vmatpush3.msra.mxu0 %v294_v30  ;;  %v286_v38 = vld [vmem:[#allocation8 + $0x30] sm:$0xff]  ;;  %v285_v39 = vld [vmem:[#allocation8 + $0x28] sm:$0xff]  ;;  %v284_v40 = vld [vmem:[#allocation8 + $0x20] sm:$0xff] }
  0x47   :  { %566 = vmatprep.subr.mxu1 %v820_v0  ;;  %597 = vmatprep.subr.mxu0 %v820_v0  ;;  %v283_v41 = vld [vmem:[#allocation8 + $0x18] sm:$0xff]  ;;  %v282_v42 = vld [vmem:[#allocation8 + $0x10] sm:$0xff]  ;;  %v281_v43 = vld [vmem:[#allocation8 + $0x8] sm:$0xff] }
  0x48   :  { %567 = vmatpush3.msra.mxu1 %v193_v8  ;;  %598 = vmatpush3.msra.mxu0 %v293_v31  ;;  %v280_v44 = vld [vmem:[#allocation8] sm:$0xff]  ;;  %v492_v45 = vld [vmem:[%s967_s4 + $0x1] ss:$0 sm:$0xff]  ;;  %v393_v54 = vld [vmem:[#allocation10 + $0x78] sm:$0xff] }
  0x49   :  { %568 = vmatprep.subr.mxu1 %v820_v0  ;;  %599 = vmatprep.subr.mxu0 %v820_v0  ;;  %v392_v55 = vld [vmem:[#allocation10 + $0x70] sm:$0xff]  ;;  %v391_v56 = vld [vmem:[#allocation10 + $0x68] sm:$0xff]  ;;  %v390_v57 = vld [vmem:[#allocation10 + $0x60] sm:$0xff] }
  0x4a   :  { %569 = vmatpush3.msra.mxu1 %v192_v9  ;;  %600 = vmatpush3.msra.mxu0 %v292_v32  ;;  %v389_v58 = vld [vmem:[#allocation10 + $0x58] sm:$0xff]  ;;  %v388_v59 = vld [vmem:[#allocation10 + $0x50] sm:$0xff]  ;;  %v387_v60 = vld [vmem:[#allocation10 + $0x48] sm:$0xff] }
  0x4b   :  { %570 = vmatprep.subr.mxu1 %v820_v0  ;;  %601 = vmatprep.subr.mxu0 %v820_v0  ;;  %v386_v61 = vld [vmem:[#allocation10 + $0x40] sm:$0xff]  ;;  %v385_v62 = vld [vmem:[#allocation10 + $0x38] sm:$0xff]  ;;  %v384_v63 = vld [vmem:[#allocation10 + $0x30] sm:$0xff] }
  0x4c   :  { %571 = vmatpush3.msra.mxu1 %v191_v10  ;;  %602 = vmatpush3.msra.mxu0 %v291_v33  ;;  %v383_v1 = vld [vmem:[#allocation10 + $0x28] sm:$0xff]  ;;  %v382_v2 = vld [vmem:[#allocation10 + $0x20] sm:$0xff]  ;;  %v381_v3 = vld [vmem:[#allocation10 + $0x18] sm:$0xff] }
  0x4d   :  { %572 = vmatprep.subr.mxu1 %v820_v0  ;;  %603 = vmatprep.subr.mxu0 %v820_v0  ;;  %v380_v4 = vld [vmem:[#allocation10 + $0x10] sm:$0xff]  ;;  %v379_v5 = vld [vmem:[#allocation10 + $0x8] sm:$0xff]  ;;  %v378_v6 = vld [vmem:[#allocation10] sm:$0xff] }
  0x4e   :  { %573 = vmatpush3.msra.mxu1 %v190_v11  ;;  %604 = vmatpush3.msra.mxu0 %v290_v34  ;;  %v494_v7 = vld [vmem:[%s967_s4 + $0x2] ss:$0 sm:$0xff]  ;;  %s785_s4 = scalar_lea.vmem %s479_s9, 128 }
  0x4f   :  { %574 = vmatprep.subr.mxu1 %v820_v0  ;;  %605 = vmatprep.subr.mxu0 %v820_v0  ;;  %p786_p11 = scmp.ne.s32.totalorder %s479_s9, %s785_s4  ;;  %p791_p13 = scmp.lt.s32.totalorder %s785_s4, %s785_s4 }
  0x50   :  { %575 = vmatpush3.msra.mxu1 %v189_v12  ;;  %606 = vmatpush3.msra.mxu0 %v289_v35 }
  0x51   :  { %576 = vmatprep.subr.mxu1 %v820_v0  ;;  %607 = vmatprep.subr.mxu0 %v820_v0  ;;  %p792_p0 = por %p791_p13, %p790_p12 }
  0x52   :  { %577 = vmatpush3.msra.mxu1 %v188_v13  ;;  %608 = vmatpush3.msra.mxu0 %v288_v36 }
  0x53   :  { %578 = vmatprep.subr.mxu1 %v820_v0  ;;  %609 = vmatprep.subr.mxu0 %v820_v0  ;;  %p793_p1 = pnand %p792_p0, %p786_p11 }
  0x54   :  { %579 = vmatpush3.msra.mxu1 %v187_v14  ;;  %610 = vmatpush3.msra.mxu0 %v287_v37 }
  0x55   :  { %580 = vmatprep.subr.mxu1 %v820_v0  ;;  %611 = vmatprep.subr.mxu0 %v820_v0 }
  0x56   :  { %581 = vmatpush3.msra.mxu1 %v186_v15  ;;  %612 = vmatpush3.msra.mxu0 %v286_v38 }
  0x57   :  { %582 = vmatprep.subr.mxu1 %v820_v0  ;;  %613 = vmatprep.subr.mxu0 %v820_v0 }
  0x58   :  { %583 = vmatpush3.msra.mxu1 %v185_v16  ;;  %614 = vmatpush3.msra.mxu0 %v285_v39 }
  0x59   :  { %584 = vmatprep.subr.mxu1 %v820_v0  ;;  %615 = vmatprep.subr.mxu0 %v820_v0 }
  0x5a   :  { %585 = vmatpush3.msra.mxu1 %v184_v17  ;;  %616 = vmatpush3.msra.mxu0 %v284_v40 }
  0x5b   :  { %586 = vmatprep.subr.mxu1 %v820_v0  ;;  %617 = vmatprep.subr.mxu0 %v820_v0 }
  0x5c   :  { %587 = vmatpush3.msra.mxu1 %v183_v18  ;;  %618 = vmatpush3.msra.mxu0 %v283_v41 }
  0x5d   :  { %588 = vmatprep.subr.mxu1 %v820_v0  ;;  %619 = vmatprep.subr.mxu0 %v820_v0 }
  0x5e   :  { %589 = vmatpush3.msra.mxu1 %v182_v19  ;;  %620 = vmatpush3.msra.mxu0 %v282_v42 }
  0x5f   :  { %628 = vmatprep.subr.mxu1 %v820_v0  ;;  %621 = vmatprep.subr.mxu0 %v820_v0 }
  0x60   :  { %622 = vmatpush3.msra.mxu0 %v281_v43 }
  0x61   :  { %623 = vmatprep.subr.mxu0 %v820_v0 }
  0x62   :  { %624 = vmatpush3.msra.mxu0 %v280_v44 }
 0x102   :  { %v171_v21 = vpop.f32.mrf.mxu0 }
 0x103   :  { %v172_v22 = vadd.f32 %v489_v20, %v171_v21 }
 0x104   :  { %v557_v23 = vpop.f32.mrf.mxu0 }
 0x105   :  { %v491_v24 = vmul.f32 -1.442695, %v172_v22 }
 0x107   :  { %673 = vpow2.f32 %v491_v24 }
 0x114   :  { %v674_v25 = vpop.eup %673 }
 0x115   :  { %v178_v26 = vadd.f32 1.0, %v674_v25 }
 0x117   :  { %675 = vrcp.f32 %v178_v26 }
 0x124   :  { %v676_v27 = vpop.eup %675 }
 0x125   :  { %v181_v28 = vmul.f32 %v676_v27, %v172_v22 }
 0x127   :  { %591 = vmatmul.mubr.f32.vlgmr.msra.gmra.mxu1 %v181_v28 }
 0x128   :  { %660 = vmatprep.mubr.msk.f32.mxu1 %vm821_vm0, %v820_v0  ;;  %629 = vmatpush3.msra.mxu1 %v393_v54 }
 0x129   :  { %630 = vmatprep.subr.mxu1 %v820_v0 }
 0x12a   :  { %631 = vmatpush3.msra.mxu1 %v392_v55 }
 0x12b   :  { %632 = vmatprep.subr.mxu1 %v820_v0 }
 0x12c   :  { %633 = vmatpush3.msra.mxu1 %v391_v56 }
 0x12d   :  { %634 = vmatprep.subr.mxu1 %v820_v0 }
 0x12e   :  { %635 = vmatpush3.msra.mxu1 %v390_v57 }
 0x12f   :  { %636 = vmatprep.subr.mxu1 %v820_v0 }
 0x130   :  { %637 = vmatpush3.msra.mxu1 %v389_v58 }
 0x131   :  { %638 = vmatprep.subr.mxu1 %v820_v0 }
 0x132   :  { %639 = vmatpush3.msra.mxu1 %v388_v59 }
 0x133   :  { %640 = vmatprep.subr.mxu1 %v820_v0 }
 0x134   :  { %641 = vmatpush3.msra.mxu1 %v387_v60 }
 0x135   :  { %642 = vmatprep.subr.mxu1 %v820_v0 }
 0x136   :  { %643 = vmatpush3.msra.mxu1 %v386_v61 }
 0x137   :  { %644 = vmatprep.subr.mxu1 %v820_v0 }
 0x138   :  { %645 = vmatpush3.msra.mxu1 %v385_v62 }
 0x139   :  { %646 = vmatprep.subr.mxu1 %v820_v0 }
 0x13a   :  { %647 = vmatpush3.msra.mxu1 %v384_v63 }
 0x13b   :  { %648 = vmatprep.subr.mxu1 %v820_v0 }
 0x13c   :  { %649 = vmatpush3.msra.mxu1 %v383_v1 }
 0x13d   :  { %650 = vmatprep.subr.mxu1 %v820_v0 }
 0x13e   :  { %651 = vmatpush3.msra.mxu1 %v382_v2 }
 0x13f   :  { %652 = vmatprep.subr.mxu1 %v820_v0 }
 0x140   :  { %653 = vmatpush3.msra.mxu1 %v381_v3 }
 0x141   :  { %654 = vmatprep.subr.mxu1 %v820_v0 }
 0x142   :  { %655 = vmatpush3.msra.mxu1 %v380_v4 }
 0x143   :  { %656 = vmatprep.subr.mxu1 %v820_v0 }
 0x144   :  { %657 = vmatpush3.msra.mxu1 %v379_v5 }
 0x145   :  { %658 = vmatprep.subr.mxu1 %v820_v0  ;;  %v496_v0 = vld [vmem:[%s969_s6] ss:$0 sm:$0xff] }
 0x146   :  { %659 = vmatpush3.msra.mxu1 %v378_v6 }
 0x1e7   :  { %v269_v46 = vpop.f32.mrf.mxu1 }
 0x1e8   :  { %v270_v47 = vadd.f32 %v492_v45, %v269_v46 }
 0x1e9   :  { %v592_v48 = vpop.f32.mrf.mxu1 }
 0x1ea   :  { %v493_v49 = vmul.f32 -1.442695, %v270_v47 }
 0x1ec   :  { %677 = vpow2.f32 %v493_v49 }
 0x1f9   :  { %v678_v50 = vpop.eup %677 }
 0x1fa   :  { %v276_v51 = vadd.f32 1.0, %v678_v50 }
 0x1fc   :  { %679 = vrcp.f32 %v276_v51 }
 0x209   :  { %v680_v52 = vpop.eup %679 }
 0x20a   :  { %v279_v53 = vmul.f32 %v680_v52, %v270_v47 }
 0x20c   :  { %626 = vmatmul.mubr.f32.vlgmr.msra.gmra.mxu0 %v279_v53 }
 0x2cc   :  { %v367_v8 = vpop.f32.mrf.mxu0 }
 0x2cd   :  { %v368_v9 = vadd.f32 %v494_v7, %v367_v8 }
 0x2ce   :  { %v627_v10 = vpop.f32.mrf.mxu0 }
 0x2cf   :  { %v495_v11 = vmul.f32 -1.442695, %v368_v9 }
 0x2d1   :  { %681 = vpow2.f32 %v495_v11 }
 0x2de   :  { %v682_v12 = vpop.eup %681 }
 0x2df   :  { %v374_v13 = vadd.f32 1.0, %v682_v12 }
 0x2e1   :  { %683 = vrcp.f32 %v374_v13 }
 0x2ee   :  { %v684_v14 = vpop.eup %683 }
 0x2ef   :  { %v377_v15 = vmul.f32 %v684_v14, %v368_v9 }
 0x2f1   :  { %661 = vmatmul.mubr.f32.vlgmr.msra.gmra.mxu1 %v377_v15 }
 0x3b1   :  { %v467_v16 = vpop.f32.mrf.mxu1 }
 0x3b2   :  { %v468_v17 = vadd.f32 %v496_v0, %v467_v16 }
 0x3b3   :  { %v662_v18 = vpop.f32.mrf.mxu1 }
 0x3b4   :  { %471 = vst [vmem:[#allocation11] sm:$0xff] %v468_v17 }
 0x3b5   :  { %796 = shalt.err (!%p793_p1)
}
 0x3b6   :  { %481 = dma.vmem_to_hbm [thread:$0]  %s479_s9, 128, %s970_s7, [#allocation4]  }
 0x3b7   :  { %811 = dma.done.wait [#allocation4], 128  }
 0x3b8   :  { %812 = vsyncadd [#allocation4], 4294967168 }
 0x3b9   :  { %485 = vsyncpa [#allocation3], 1 }
 0x3ba   :  { %486 = vsyncpa [#allocation6], 1 }
 0x3bb   :  { %487 = vsyncpa [#allocation9], 1 }
 0x3bc   :  { %488 = vsyncpa [#allocation4], 1 }

</bundles_post_ra>
